<compile_context>
chip_gen: v7x
topology: tpu7x:2x2x1
jax: 0.10.0
libtpu: 0.0.40
codegen_flags: <defaults>
</compile_context>

<pallas_src>
import functools

import jax
import jax.numpy as jnp
from jax.experimental import pallas as pl
from jax.experimental.pallas import tpu as pltpu


_NEG_INF = -1e30  # select fill for non-target classes: exp(-1e30 - m) == 0


def _focal_loss_kernel(logits_ref, targets_ref, alpha_t_ref, out_ref, *,
                       gamma, n_valid, tile_b):
    i = pl.program_id(0)

    x = logits_ref[...].astype(jnp.float32)             # (TB, C) f32 compute
    tb, c = x.shape

    # Row-wise, numerically stable softmax pieces (full-tile work).
    m = jnp.max(x, axis=-1, keepdims=True)               # (TB, 1)
    e = jnp.exp(x - m)                                    # (TB, C)  EUP pass
    s = jnp.sum(e, axis=-1, keepdims=True)                # (TB, 1)

    # Gather the target-class logit via iota compare + select + row max
    # (no materialized float one-hot, no extra full-tile multiply).
    t = targets_ref[...]                                  # (TB, 1) int32
    cls = jax.lax.broadcasted_iota(jnp.int32, (tb, c), 1)
    x_t = jnp.max(jnp.where(cls == t, x, _NEG_INF), axis=-1, keepdims=True)

    # Narrow (TB, 1) column math from here on.
    e_t = jnp.exp(x_t - m)                                 # (TB, 1)
    p_t = e_t / s                                          # <= 1 by construction
    log_p = jnp.log(p_t + 1e-12)

    if gamma == 2.0:
        w = 1.0 - p_t
        focal_w = w * w                                    # avoid pow()
    else:
        focal_w = (1.0 - p_t) ** gamma

    loss = -alpha_t_ref[...] * focal_w * log_p             # (TB, 1)

    # Mask rows beyond the true batch (the last block may read past the edge
    # of the un-padded inputs).  Must happen before the reduction/write.
    row = jax.lax.broadcasted_iota(jnp.int32, (tb, 1), 0) + i * tile_b
    loss = jnp.where(row < n_valid, loss, 0.0)

    # One partial sum per grid step, written lane-dense; the wrapper reads
    # element [i, 0, 0] of each block.
    tile_sum = jnp.sum(loss, axis=0, keepdims=True)        # (1, 1)
    out_ref[...] = jnp.broadcast_to(tile_sum.reshape(1, 1, 1), (1, 8, 128))


def multi_focal_loss(logits, targets, alpha, *, gamma=2.0, reduction="mean",
                     target_tile_bytes=4 << 20,
                     vmem_limit_bytes=40 * 1024 * 1024):
    """Focal loss matching the PyTorch module's forward (mean/sum reduction).

    logits:  (N, C) float (any float dtype; streamed in native dtype)
    targets: (N,)   int
    alpha:   (C,)   float
    """
    n, c = logits.shape

    # Batch tile: ~target_tile_bytes of (lane-padded, f32-equivalent) logits
    # per buffer, a multiple of 8.  Capped so the 1-D grid has >= 2 steps when
    # possible so dimension_semantics=("parallel",) can split across v7x cores.
    c_lanes = max(128, ((c + 127) // 128) * 128)
    tile_b = max(8, (target_tile_bytes // (c_lanes * 4)) // 8 * 8)
    n_rounded = ((n + 7) // 8) * 8
    tile_b = min(tile_b, n_rounded)
    if n_rounded > 8:
        half = (((n + 1) // 2 + 7) // 8) * 8
        tile_b = min(tile_b, half)
    grid = pl.cdiv(n, tile_b)

    # Tiny wrapper-side prep: column views of targets and alpha[targets].
    targets_col = targets.reshape(n, 1).astype(jnp.int32)
    alpha_t_col = alpha.astype(jnp.float32)[targets].reshape(n, 1)

    kernel = functools.partial(_focal_loss_kernel, gamma=float(gamma),
                               n_valid=n, tile_b=tile_b)

    per_tile = pl.pallas_call(
        kernel,
        out_shape=jax.ShapeDtypeStruct((grid, 8, 128), jnp.float32),
        grid_spec=pltpu.PrefetchScalarGridSpec(
            num_scalar_prefetch=0,
            grid=(grid,),
            in_specs=[
                pl.BlockSpec((tile_b, c), lambda i: (i, 0)),   # logits, native dtype
                pl.BlockSpec((tile_b, 1), lambda i: (i, 0)),   # targets
                pl.BlockSpec((tile_b, 1), lambda i: (i, 0)),   # alpha[targets]
            ],
            out_specs=pl.BlockSpec((1, 8, 128), lambda i: (i, 0, 0)),
        ),
        compiler_params=pltpu.CompilerParams(
            dimension_semantics=("parallel",),
            vmem_limit_bytes=vmem_limit_bytes),
    )(logits, targets_col, alpha_t_col)

    total = jnp.sum(per_tile[:, 0, 0])
    if reduction == "sum":
        return total
    # TODO(synk): reduction='none' (per-element losses) would need a per-row
    # output; only 'mean'/'sum' are emitted by this kernel.
    return total / jnp.float32(n)


def _reference(logits, targets, alpha, gamma):
    probs = jax.nn.softmax(logits, axis=-1)
    p_t = probs[jnp.arange(logits.shape[0]), targets]
    log_p = jnp.log(p_t + 1e-12)
    a_t = alpha[targets]
    loss = -a_t * (1.0 - p_t) ** gamma * log_p
    return jnp.mean(loss)


if __name__ == "__main__":
    key = jax.random.PRNGKey(0)
    k1, k2 = jax.random.split(key)

    N, NUM_CLASS = 20, 8          # N not a multiple of the tile -> tail mask path
    GAMMA = 2.0

    logits = jax.random.normal(k1, (N, NUM_CLASS), dtype=jnp.float32)
    targets = jax.random.randint(k2, (N,), 0, NUM_CLASS, dtype=jnp.int32)
    # alpha=None in the module -> ones(num_class) - 0.5
    alpha = jnp.ones((NUM_CLASS,), dtype=jnp.float32) - 0.5

    loss = multi_focal_loss(logits, targets, alpha, gamma=GAMMA)
    loss = jax.block_until_ready(loss)

    ref = _reference(logits, targets, alpha, GAMMA)
    assert jnp.allclose(loss, ref, atol=1e-5, rtol=1e-5), (loss, ref)

    print("KERNEL_OK")
</pallas_src>

<mosaic_0001>
module attributes {stable_mosaic.version = 11 : i64} {
  func.func @_focal_loss_kernel(%arg0: i32, %arg1: memref<16x8xf32, #tpu.memory_space<vmem>>, %arg2: memref<16x1xi32, #tpu.memory_space<vmem>>, %arg3: memref<16x1xf32, #tpu.memory_space<vmem>>, %arg4: memref<1x8x128xf32, #tpu.memory_space<vmem>>) attributes {dimension_semantics = [#tpu.dimension_semantics<parallel>], iteration_bounds = array<i64: 2>, scalar_prefetch = 0 : i64, scratch_operands = 0 : i64, tpu.core_type = #tpu.core_type<tc>, window_params = [{transform_indices = @transform_0, window_bounds = array<i64: 16, 8>}, {transform_indices = @transform_1, window_bounds = array<i64: 16, 1>}, {transform_indices = @transform_2, window_bounds = array<i64: 16, 1>}, {transform_indices = @transform_3, window_bounds = array<i64: 1, 8, 128>}]} {
    %c0 = arith.constant 0 : index
    %c0_0 = arith.constant 0 : index
    %0 = vector.load %arg1[%c0, %c0_0] : memref<16x8xf32, #tpu.memory_space<vmem>>, vector<16x8xf32>
    %cst = arith.constant dense<0xFF800000> : vector<16xf32>
    %1 = vector.multi_reduction <maximumf>, %0, %cst [1] : vector<16x8xf32> to vector<16xf32>
    %2 = vector.shape_cast %1 : vector<16xf32> to vector<16x1xf32>
    %3 = vector.broadcast %2 : vector<16x1xf32> to vector<16x8xf32>
    %4 = arith.subf %0, %3 : vector<16x8xf32>
    %5 = math.exp %4 : vector<16x8xf32>
    %cst_1 = arith.constant dense<0.000000e+00> : vector<16xf32>
    %6 = vector.multi_reduction <add>, %5, %cst_1 [1] : vector<16x8xf32> to vector<16xf32>
    %7 = vector.shape_cast %6 : vector<16xf32> to vector<16x1xf32>
    %c0_2 = arith.constant 0 : index
    %c0_3 = arith.constant 0 : index
    %8 = vector.load %arg2[%c0_2, %c0_3] : memref<16x1xi32, #tpu.memory_space<vmem>>, vector<16x1xi32>
    %9 = tpu.iota {dimensions = array<i32: 1>} : vector<16x8xi32>
    %10 = vector.broadcast %8 : vector<16x1xi32> to vector<16x8xi32>
    %11 = arith.cmpi eq, %9, %10 : vector<16x8xi32>
    %cst_4 = arith.constant -1.000000e+30 : f32
    %12 = vector.broadcast %cst_4 : f32 to vector<16x8xf32>
    %13 = arith.select %11, %0, %12 : vector<16x8xi1>, vector<16x8xf32>
    %cst_5 = arith.constant dense<0xFF800000> : vector<16xf32>
    %14 = vector.multi_reduction <maximumf>, %13, %cst_5 [1] : vector<16x8xf32> to vector<16xf32>
    %15 = vector.shape_cast %14 : vector<16xf32> to vector<16x1xf32>
    %16 = arith.subf %15, %2 : vector<16x1xf32>
    %17 = math.exp %16 : vector<16x1xf32>
    %18 = arith.divf %17, %7 : vector<16x1xf32>
    %cst_6 = arith.constant 9.99999996E-13 : f32
    %19 = vector.broadcast %cst_6 : f32 to vector<16x1xf32>
    %20 = arith.addf %18, %19 : vector<16x1xf32>
    %21 = math.log %20 : vector<16x1xf32>
    %cst_7 = arith.constant 1.000000e+00 : f32
    %22 = vector.broadcast %cst_7 : f32 to vector<16x1xf32>
    %23 = arith.subf %22, %18 : vector<16x1xf32>
    %24 = arith.mulf %23, %23 : vector<16x1xf32>
    %c0_8 = arith.constant 0 : index
    %c0_9 = arith.constant 0 : index
    %25 = vector.load %arg3[%c0_8, %c0_9] : memref<16x1xf32, #tpu.memory_space<vmem>>, vector<16x1xf32>
    %cst_10 = arith.constant 0.000000e+00 : f32
    %26 = vector.broadcast %cst_10 : f32 to vector<16x1xf32>
    %27 = arith.subf %26, %25 : vector<16x1xf32>
    %28 = arith.mulf %27, %24 : vector<16x1xf32>
    %29 = arith.mulf %28, %21 : vector<16x1xf32>
    %30 = tpu.iota {dimensions = array<i32: 0>} : vector<16x1xi32>
    %c16_i32 = arith.constant 16 : i32
    %31 = arith.muli %arg0, %c16_i32 : i32
    %32 = vector.broadcast %31 : i32 to vector<16x1xi32>
    %33 = arith.addi %30, %32 : vector<16x1xi32>
    %c20_i32 = arith.constant 20 : i32
    %34 = vector.broadcast %c20_i32 : i32 to vector<16x1xi32>
    %35 = arith.cmpi slt, %33, %34 : vector<16x1xi32>
    %cst_11 = arith.constant 0.000000e+00 : f32
    %36 = vector.broadcast %cst_11 : f32 to vector<16x1xf32>
    %37 = arith.select %35, %29, %36 : vector<16x1xi1>, vector<16x1xf32>
    %cst_12 = arith.constant dense<0.000000e+00> : vector<1xf32>
    %38 = vector.multi_reduction <add>, %37, %cst_12 [0] : vector<16x1xf32> to vector<1xf32>
    %39 = vector.shape_cast %38 : vector<1xf32> to vector<1x1xf32>
    %40 = vector.shape_cast %39 : vector<1x1xf32> to vector<1x1x1xf32>
    %41 = vector.shape_cast %40 : vector<1x1x1xf32> to vector<1x1x1xf32>
    %42 = vector.broadcast %41 : vector<1x1x1xf32> to vector<1x8x128xf32>
    %c0_13 = arith.constant 0 : index
    %c0_14 = arith.constant 0 : index
    %c0_15 = arith.constant 0 : index
    %43 = vector.load %arg4[%c0_13, %c0_14, %c0_15] : memref<1x8x128xf32, #tpu.memory_space<vmem>>, vector<1x8x128xf32>
    tpu.vector_store %arg4[%c0_13, %c0_14, %c0_15], %42 {strides = array<i32>} : memref<1x8x128xf32, #tpu.memory_space<vmem>>, vector<1x8x128xf32>,
    return
  }
  func.func @transform_0(%arg0: i32) -> (i32, i32) {
    %c0_i32 = arith.constant 0 : i32
    %c0_i32_0 = arith.constant 0 : i32
    return %arg0, %c0_i32 : i32, i32
  }
  func.func @transform_1(%arg0: i32) -> (i32, i32) {
    %c0_i32 = arith.constant 0 : i32
    %c0_i32_0 = arith.constant 0 : i32
    return %arg0, %c0_i32 : i32, i32
  }
  func.func @transform_2(%arg0: i32) -> (i32, i32) {
    %c0_i32 = arith.constant 0 : i32
    %c0_i32_0 = arith.constant 0 : i32
    return %arg0, %c0_i32 : i32, i32
  }
  func.func @transform_3(%arg0: i32) -> (i32, i32, i32) {
    %c0_i32 = arith.constant 0 : i32
    %c0_i32_0 = arith.constant 0 : i32
    %c0_i32_1 = arith.constant 0 : i32
    return %arg0, %c0_i32, %c0_i32_0 : i32, i32, i32
  }
}

</mosaic_0001>

<bundles_post_ra>
// kernel: tpu_custom_call.1
= control target key start
LH: loop header
LB: loop body
LE: loop exit
PB: predicated region body
PF: predicated region fallthrough
CT: control target
= control target key end

     0   :  { %8 = vsyncpa [#allocation3], 0  ;;  %s745_s0 = inlined_call_operand.vmem [shape: f32[20,8], index: 0, kind: input, shape index: {}]   ;;  %s746_s1 = inlined_call_operand.vmem [shape: s32[20,1], index: 1, kind: input, shape index: {}]   ;;  %s747_s2 = inlined_call_operand.vmem [shape: f32[20,1], index: 2, kind: input, shape index: {}]   ;;  %s748_s3 = inlined_call_operand.hbm [shape: f32[2,8,128], index: 3, kind: output, shape index: {}]  }
   0x1   :  { %10 = vsyncpa [#allocation3 + $0x1], 0  ;;  %s628_s12 = smov 0   ;;  %s630_s13 = smov 0  }
   0x2   :  { %s632_s14 = smov 0   ;;  %s634_s15 = smov 0  }
   0x3 LB: > { %s649_s16 = sadd.s32 4294967295, %s604_s15   ;;  %s468_s17 = sadd.s32 4294967294, %s604_s15   ;;  %s604_s15 = sphi %s634_s15, %s754_s15   ;;  %s600_s14 = sphi %s632_s14, %s753_s14   ;;  %s596_s13 = sphi %s630_s13, %s752_s13   ;;  %s592_s12 = sphi %s628_s12, %s751_s12  }
   0x4   : > { %s653_s18 = sadd.s32 1, %s604_s15   ;;  %s101_s19 = sadd.s32 1, %s600_s14 }
   0x5   : > { %s98_s20 = ssub.s32 %s604_s15, %s653_s18  ;;  %p111_p0 = scmp.ne.s32.totalorder %s600_s14, %s596_s13 }
   0x6   : > { %p99_p1 = scmp.eq.s32.totalorder %s98_s20, 0  ;;  %p112_p2 = scmp.eq.s32.totalorder %s649_s16, 1 }
   0x7   : > { %p117_p3 = scmp.ne.s32.totalorder %s596_s13, %s592_s12  ;;  %p118_p4 = scmp.eq.s32.totalorder %s468_s17, 1 }
   0x8   : > { %s664_s21 = scalar_select %p99_p1, %s600_s14, %s101_s19  }
   0x9   : > { %p666_p5 = por %p112_p2, %p111_p0  ;;  %p670_p6 = por %p118_p4, %p117_p3 }
   0xa   : > { %p471_p7 = scmp.ge.s32.totalorder %s604_s15, 1  ;;  %p187_p8 = scmp.lt.s32.totalorder %s604_s15, 3 }
   0xc   : > { %p188_p9 = pnand %p471_p7, %p187_p8 }
   0xd   : > { %s473_s24 = sshll.u32 (!%p188_p9), %s649_s16, 1  ;;  %v606_v0 = vmov (!%p188_p9), 0   ;;  %vm277_vm0 = vcmask (!%p188_p9), 64512   ;;  %v298_v7 = vlaneseq (!%p188_p9)  ;;  %s479_s8 = sshll.u32 (!%p188_p9), %s649_s16, 4  ;;  %vm355_vm5 = vcmask (!%p188_p9), 7168  }
   0xe   : > { %191 = sbr.rel (%p188_p9) target bundleno = 519 (0x207), region = 32  ;;  %524 = vset.pattern.permute.xlu1 (!%p188_p9), %v606_v0  ;;  %p238_p10 = scmp.lt.s32.totalorder (!%p188_p9), %s473_s24, 2  ;;  %525 = vset.pattern.permute.xlu0 (!%p188_p9), %v606_v0  ;;  %v348_v44 = vstv (!%p188_p9), %s479_s8 }
   0xf   : > { %v299_v8 = vand.u32 (!%p188_p9), 127, %v298_v7  ;;  %v345_v43 = vshrl.u32 (!%p188_p9), %v298_v7, 7  ;;  %s230_s9 = sand.u32 (!%p188_p9), 1, %s596_s13   ;;  %s481_s19 = sshll.u32 (!%p188_p9), %s649_s16, 7 }
  0x10   : > { %s472_s10 = sshll.u32 (!%p188_p9), %s230_s9, 3  ;;  %s372_s26 = scalar_lea.sflag (!%p188_p9), [#allocation3], %s230_s9 }
  0x11   : > { %v346_v49 = vadd.s32 (!%p188_p9), 8, %v345_v43  ;;  %v349_v50 = vadd.s32 (!%p188_p9), %v348_v44, %v345_v43  ;;  %s232_s11 = scalar_lea.vmem (!%p188_p9), [#allocation2], %s472_s10 }
  0x12   : > { %s385_s17 = sshll.u32 (!%p188_p9), %s232_s11, 4  ;;  %s700_s17 = int_to_ptr.vmem [resolvable:$true] %s385_s17 }
  0x13   : > { %v350_v56 = vadd.s32 (!%p188_p9), %v348_v44, %v346_v49  ;;  %vm351_vm3 = vcmp.lt.s32.totalorder (!%p188_p9), %v349_v50, 20  ;;  %s542_s27 = scalar_lea.vmem (!%p188_p9), %s700_s17, 128 }
  0x14   : > { %p543_p11 = scmp.ne.s32.totalorder (!%p188_p9), %s700_s17, %s542_s27 }
  0x15   : > { %s756_s24 = smov (!%p238_p10, %s473_s24), 2  ;;  %vm352_vm4 = vcmp.lt.s32.totalorder %v350_v56, 20 }
  0x16   : > { %s677_s25 = sshll.u32 %s756_s24, 3  ;;  %p544_p12 = pnand %p543_p11, %p666_p5 }
  0x17   : > { %s255_s28 = scalar_lea.vmem %s746_s1, %s677_s25  ;;  %s241_s4 = scalar_lea.vmem %s745_s0, %s677_s25 }
  0x18   : > { %v296_v1 = vld [vmem:[%s255_s28] sm:$0xff]  ;;  %v276_v3 = vld [vmem:[%s241_s4 + $0x8] sm:$0xff]  ;;  %s269_s7 = scalar_lea.vmem %s747_s2, %s677_s25  ;;  %s705_s25 = scalar_lea.hbm %s748_s3, %s481_s19 }
  0x19   : > { %301 = vperm.xlu1 %524, %v296_v1   ;;  %v275_v2 = vld [vmem:[%s241_s4] sm:$0xff]  ;;  %v297_v5 = vld [vmem:[%s255_s28 + $0x8] sm:$0xff]  ;;  %v281_v6 = vsel %vm277_vm0, %v276_v3, -inf  ;;  %p545_p13 = pneg %p544_p12  ;;  %s607_s28 = smov [#allocation2]  }
  0x1a   : > { %v278_v4 = vsel %vm277_vm0, %v275_v2, -inf  ;;  %v336_v42 = vld [vmem:[%s269_s7] sm:$0xff]  ;;  %v337_v48 = vld [vmem:[%s269_s7 + $0x8] sm:$0xff]  ;;  %s546_s16 = sshll.u32 %s607_s28, 4  ;;  %s547_s16 = int_to_ptr.vmem [resolvable:$false] %s546_s16 }
  0x1b   : > { %279 = vmax.xlane.f32.xlu0 %v278_v4  ;;  %v338_v45 = vsub.f32 0.0, %v336_v42  ;;  %v339_v52 = vsub.f32 0.0, %v337_v48  ;;  %s548_s29 = scalar_lea.vmem %s547_s16, 256  ;;  %p549_p0 = scmp.lt.s32.totalorder %s700_s17, %s547_s16 }
  0x1c   : > { %p550_p1 = scmp.lt.s32.totalorder %s548_s29, %s542_s27 }
  0x1d   : > { %304 = vperm.xlu1 %524, %v297_v5  }
  0x1e   : > { %p551_p2 = por %p550_p1, %p549_p0 }
  0x1f   : > { %282 = vmax.xlane.f32.xlu0 %v281_v6 }
  0x20   : > { %p552_p3 = pnand %p551_p2, %p545_p13 }
  0x98   : > { %v302_v9 = vpop.permute.xlu1 %301 }
  0x99   : > { %vm306_vm1 = vcmp.eq.s32.totalorder %v299_v8, %v302_v9 }
  0x9a   : > { %v308_v10 = vsel %vm306_vm1, %v275_v2, -1e+30 }
  0x9b   : > { %v310_v11 = vsel %vm277_vm0, %v308_v10, -inf }
  0x9c   : > { %v305_v12 = vpop.permute.xlu1 %304  ;;  %311 = vmax.xlane.f32.xlu0 %v310_v11 }
  0x9d   : > { %vm307_vm2 = vcmp.eq.s32.totalorder %v299_v8, %v305_v12 }
  0x9e   : > { %v309_v13 = vsel %vm307_vm2, %v276_v3, -1e+30 }
  0x9f   : > { %v313_v14 = vsel %vm277_vm0, %v309_v13, -inf }
  0xa0   : > { %314 = vmax.xlane.f32.xlu1 %v313_v14 }
  0xa8   : > { %v280_v15 = vpop.xlane.xlu0 %279 }
  0xa9   : > { %v284_v16 = vsub.f32 %v275_v2, %v280_v15 }
  0xab   : > { %v286_v17 = vmul.f32 1.442695, %v284_v16 }
  0xac   : > { %v283_v18 = vpop.xlane.xlu0 %282 }
  0xad   : > { %526 = vpow2.f32 %v286_v17  ;;  %v285_v19 = vsub.f32 %v276_v3, %v283_v18 }
  0xaf   : > { %v288_v20 = vmul.f32 1.442695, %v285_v19 }
  0xb1   : > { %528 = vpow2.f32 %v288_v20 }
  0xb7   : > { %v527_v21 = vpop.eup %526 }
  0xb8   : > { %v290_v22 = vsel %vm277_vm0, %v527_v21, 0.0 }
  0xb9   : > { %291 = vadd.xlane.f32.xlu0 %v290_v22 }
  0xbb   : > { %v529_v23 = vpop.eup %528 }
  0xbc   : > { %v293_v24 = vsel %vm277_vm0, %v529_v23, 0.0 }
  0xbd   : > { %294 = vadd.xlane.f32.xlu0 %v293_v24 }
 0x129   : > { %v312_v25 = vpop.xlane.xlu0 %311 }
 0x12a   : > { %v316_v26 = vsub.f32 %v312_v25, %v280_v15 }
 0x12c   : > { %v318_v28 = vmul.f32 1.442695, %v316_v26 }
 0x12d   : > { %v315_v27 = vpop.xlane.xlu1 %314 }
 0x12e   : > { %v317_v29 = vsub.f32 %v315_v27, %v283_v18  ;;  %530 = vpow2.f32 %v318_v28 }
 0x130   : > { %v320_v30 = vmul.f32 1.442695, %v317_v29 }
 0x138   : > { %v531_v33 = vpop.eup %530 }
 0x146   : > { %v292_v31 = vpop.xlane.xlu0 %291 }
 0x147   : > { %532 = vrcp.f32 %v292_v31 }
 0x148   : > { %534 = vpow2.f32 %v320_v30 }
 0x14a   : > { %v295_v32 = vpop.xlane.xlu0 %294 }
 0x14b   : > { %536 = vrcp.f32 %v295_v32 }
 0x151   : > { %v533_v34 = vpop.eup %532 }
 0x152   : > { %v323_v35 = vmul.f32 %v533_v34, %v531_v33  ;;  %v535_v36 = vpop.eup %534 }
 0x154   : > { %v326_v37 = vadd.f32 1e-12, %v323_v35  ;;  %v332_v41 = vsub.f32 1.0, %v323_v35 }
 0x155   : > { %v537_v38 = vpop.eup %536 }
 0x156   : > { %538 = vlog2.f32 %v326_v37  ;;  %v325_v39 = vmul.f32 %v537_v38, %v535_v36  ;;  %v334_v46 = vmul.f32 %v332_v41, %v332_v41 }
 0x158   : > { %v327_v40 = vadd.f32 1e-12, %v325_v39  ;;  %v333_v47 = vsub.f32 1.0, %v325_v39  ;;  %v340_v55 = vmul.f32 %v338_v45, %v334_v46 }
 0x15a   : > { %540 = vlog2.f32 %v327_v40  ;;  %v335_v53 = vmul.f32 %v333_v47, %v333_v47 }
 0x15c   : > { %v341_v60 = vmul.f32 %v339_v52, %v335_v53 }
 0x160   : > { %v539_v51 = vpop.eup %538 }
 0x161   : > { %v329_v54 = vmul.f32 0.6931472, %v539_v51 }
 0x163   : > { %v342_v57 = vmul.f32 %v340_v55, %v329_v54 }
 0x164   : > { %v541_v58 = vpop.eup %540 }
 0x165   : > { %v331_v59 = vmul.f32 0.6931472, %v541_v58  ;;  %v353_v61 = vsel %vm351_vm3, %v342_v57, 0.0 }
 0x166   : > { %v356_v0 = vsel %vm355_vm5, %v353_v61, 0.0 }
 0x167   : > { %v343_v62 = vmul.f32 %v341_v60, %v331_v59 }
 0x169   : > { %v354_v63 = vsel %vm352_vm4, %v343_v62, 0.0 }
 0x16a   : > { %v357_v1 = vsel %vm355_vm5, %v354_v63, 0.0 }
 0x16b   : > { %v358_v2 = vadd.f32 %v357_v1, %v356_v0 }
 0x16d   : > { %v359_v3 = vrot.slane %v358_v2, 4 }
 0x16f   : > { %v360_v4 = vadd.f32 %v359_v3, %v358_v2 }
 0x171   : > { %v361_v5 = vrot.slane %v360_v4, 2 }
 0x173   : > { %v362_v6 = vadd.f32 %v361_v5, %v360_v4 }
 0x175   : > { %v363_v7 = vrot.slane %v362_v6, 1 }
 0x177   : > { %v364_v8 = vadd.f32 %v363_v7, %v362_v6 }
 0x179   : > { %367 = vperm.xlu0 %525, %v364_v8  }
 0x1f8   : > { %v368_v9 = vpop.permute.xlu0 %367 }
 0x1f9   : > { %370 = vst [vmem:[%s232_s11] sm:$0xff] %v368_v9 }
 0x1fa   : > { %555 = shalt.err (!%p552_p3)
}
 0x1fb   : > { %s556_s30 = scalar_lea.hbm %s705_s25, 128  ;;  %s560_s6 = scalar_lea.hbm %s748_s3, 256 }
 0x1fc   : > { %p557_p4 = scmp.ne.s32.totalorder %s705_s25, %s556_s30  ;;  %p561_p9 = scmp.lt.u32.totalorder %s705_s25, %s748_s3 }
 0x1fd   : > { %p562_p10 = scmp.lt.u32.totalorder %s560_s6, %s556_s30  ;;  %p564_p12 = scmp.lt.u32.totalorder %s556_s30, %s705_s25 }
 0x1fe   : > { %p558_p7 = pnand %p557_p4, %p666_p5 }
 0x1ff   : > { %p563_p11 = por %p562_p10, %p561_p9 }
 0x200   : > { %p559_p8 = pneg %p558_p7 }
 0x201   : > { %p565_p13 = por %p564_p12, %p563_p11 }
 0x203   : > { %p566_p0 = pnand %p565_p13, %p559_p8 }
 0x205   : > { %569 = shalt.err (!%p566_p0)
}
 0x206   : > { %484 = dma.vmem_to_hbm [thread:$0]  (%p666_p5), %s700_s17, 128, %s705_s25, %s372_s26  }
 0x207 PF: > { %p490_p1 = scmp.ge.s32.totalorder %s604_s15, 2  ;;  %s397_s9 = sand.u32 1, %s592_s12  }
 0x208   : > { %s398_s10 = scalar_lea.sflag [#allocation3], %s397_s9 }
 0x209   : > { %p487_p2 = pnand %p490_p1, %p670_p6 }
 0x20b   : > { %587 = dma.done.wait (!%p487_p2), %s398_s10, 128  }
 0x20c   : > { %589 = vsyncadd (!%p487_p2), %s398_s10, 4294967168  ;;  %p13_p3 = scmp.ge.s32.totalorder %s653_s18, 4   ;;  %s751_s12 = smov %s596_s13 }
 0x20d   : > { %s752_s13 = smov %s600_s14  ;;  %s753_s14 = smov %s664_s21 }
 0x20e   : > { %s754_s15 = smov %s653_s18  ;;  %15 = sbr.rel (!%p13_p3) target bundleno = 3 (0x3), region = 73 }
 0x215   :  { %403 = vsyncpa [#allocation3], 1 }
 0x216   :  { %405 = vsyncpa [#allocation3 + $0x1], 1 }

</bundles_post_ra>
